<compile_context>
chip_gen: v7x
topology: tpu7x:2x2x1
jax: 0.10.0
libtpu: 0.0.40
codegen_flags: <defaults>
</compile_context>

<pallas_src>
import jax
import jax.numpy as jnp
from jax import lax
from jax.experimental import pallas as pl
from jax.experimental.pallas import tpu as pltpu


def _intra_attention_kernel(w_ref, hb_ref, xT_ref, cT_ref, alphaT_ref):
    # Block shapes (per grid point (b, t)):
    #   w_ref:      (dim, dim)  nn.Linear weight (out, in), bias=False — VMEM-resident
    #   hb_ref:     (n, dim)    history for batch b                    — resident per b
    #   xT_ref:     (dim, TB)   TB step queries for batch b, steps on the lane axis
    #   cT_ref:     (dim, TB)   context vectors, steps on the lane axis
    #   alphaT_ref: (n, TB)     attention weights, steps on the lane axis (f32)
    f32 = jnp.float32
    w = w_ref[...]
    hb = hb_ref[...]
    xT = xT_ref[...]

    # q^T = W @ x^T   (== linear(h_t) = h_t @ W^T, kept transposed: steps on lanes).
    qT = jnp.dot(w, xT, preferred_element_type=f32)                      # (dim, TB)

    # e^T[i, r] = h[i, b] . q[r]      (hb is promoted to f32 if inputs are bf16)
    eT = jnp.dot(hb, qT, preferred_element_type=f32)                     # (n, TB)

    # softmax over source positions (axis 0), in f32.  For TB=128 this whole block
    # is one f32 vreg; the max/sum are cheap sublane reductions.
    m = jnp.max(eT, axis=0, keepdims=True)                               # (1, TB)
    p = jnp.exp(eT - m)
    denom = jnp.sum(p, axis=0, keepdims=True)                            # (1, TB)
    # Exact reciprocal (VALU/Newton path).  approx=True would use the EUP vrcp slot
    # but costs mantissa bits; exactness is kept so alpha matches the f32 reference.
    alphaT = p * pl.reciprocal(denom, approx=False)                      # (n, TB)

    # c^T[d, r] = sum_i h[i, b, d] * alpha[r, i]
    cT = lax.dot_general(hb, alphaT, (((0,), (0,)), ((), ())),
                         preferred_element_type=f32)                     # (dim, TB)

    cT_ref[...] = cT.astype(cT_ref.dtype)
    alphaT_ref[...] = alphaT.astype(alphaT_ref.dtype)                    # always f32


def intra_attention_steps(h_t_steps, h, W, *, block_steps=128):
    """Non-temporal IntraAttention over T decode steps that share the same history.

    Args:
      h_t_steps: [T, bs, dim]  decoder states, one per step
      h:         [n, bs, dim]  shared history (PyTorch layout)
      W:         [dim, dim]    nn.Linear weight (out, in), bias=False
      block_steps: steps per grid point; multiple of 128 (lane-dense slabs).
    Returns:
      c:     [T, bs, dim]  context vectors (dtype of h_t_steps)
      alpha: [T, bs, n]    attention weights (float32)
    """
    T, bs, dim = h_t_steps.shape
    n, _bs, _dim = h.shape
    assert (_bs, _dim) == (bs, dim)
    assert W.shape == (dim, dim)
    assert block_steps % 128 == 0, "block_steps must be a multiple of 128 (lane width)"

    TB = block_steps
    T_pad = ((T + TB - 1) // TB) * TB
    x = h_t_steps
    if T_pad != T:
        # Zero-padded steps just produce a uniform softmax over the history; they are
        # computed (cheaply) and sliced away below.
        x = jnp.pad(x, ((0, T_pad - T), (0, 0), (0, 0)))

    # One-time wrapper layout plumbing (amortised over all T steps): step queries go
    # steps-on-lanes, the history becomes contiguous per batch element.
    xT = jnp.transpose(x, (1, 2, 0))        # [bs, dim, T_pad]
    h_bt = jnp.transpose(h, (1, 0, 2))      # [bs, n,   dim]

    grid = (bs, T_pad // TB)

    cT, alphaT = pl.pallas_call(
        _intra_attention_kernel,
        out_shape=(
            jax.ShapeDtypeStruct((bs, dim, T_pad), h_t_steps.dtype),
            jax.ShapeDtypeStruct((bs, n, T_pad), jnp.float32),
        ),
        grid_spec=pltpu.PrefetchScalarGridSpec(
            num_scalar_prefetch=0,
            grid=grid,
            in_specs=[
                # W: fetched once, VMEM-resident for the whole grid.
                pl.BlockSpec((dim, dim), lambda b, t: (0, 0)),
                # h[b]: resident across the step axis, re-fetched only when b changes.
                pl.BlockSpec((pl.Squeezed(), n, dim), lambda b, t: (b, 0, 0)),
                # step queries: streamed / double-buffered along t.
                pl.BlockSpec((pl.Squeezed(), dim, TB), lambda b, t: (b, 0, t)),
            ],
            out_specs=(
                pl.BlockSpec((pl.Squeezed(), dim, TB), lambda b, t: (b, 0, t)),
                pl.BlockSpec((pl.Squeezed(), n, TB), lambda b, t: (b, 0, t)),
            ),
        ),
        compiler_params=pltpu.CompilerParams(
            dimension_semantics=("parallel", "parallel")),  # v7x: both TCs split the grid
    )(W, h_bt, xT)

    c = jnp.transpose(cT, (2, 0, 1))[:T]           # [T, bs, dim]
    alpha = jnp.transpose(alphaT, (2, 0, 1))[:T]   # [T, bs, n]
    return c, alpha


def intra_attention(h_t, h, W, *, block_steps=128):
    """Single-step module API: h_t [bs, dim], h [n, bs, dim] -> (c_t [bs,dim], alpha [bs,n]).

    Prefer intra_attention_steps() for real decoding loops: a single step is entirely
    dominated by dispatch/DMA setup and cannot be made fast in isolation.
    """
    c, alpha = intra_attention_steps(h_t[None], h, W, block_steps=block_steps)
    return c[0], alpha[0]


if __name__ == "__main__":
    key = jax.random.PRNGKey(0)
    bs, dim, n, T = 2, 32, 8, 8
    k1, k2, k3 = jax.random.split(key, 3)

    h_t_steps = jax.random.normal(k1, (T, bs, dim), jnp.float32)   # T decode-step queries
    h = jax.random.normal(k2, (n, bs, dim), jnp.float32)           # shared history
    # Deterministic nn.Linear(dim, dim, bias=False)-shaped weight init.
    bound = 1.0 / (dim ** 0.5)
    W = jax.random.uniform(k3, (dim, dim), jnp.float32, minval=-bound, maxval=bound)

    c, alpha = intra_attention_steps(h_t_steps, h, W)
    jax.block_until_ready((c, alpha))

    # Pure-JAX reference (mirrors the PyTorch forward for each step).
    q_ref = jnp.einsum('tbd,ed->tbe', h_t_steps, W)        # linear(h_t) = h_t @ W^T
    e_ref = jnp.einsum('tbd,nbd->tbn', q_ref, h)
    a_ref = jax.nn.softmax(e_ref, axis=-1)
    c_ref = jnp.einsum('tbn,nbd->tbd', a_ref, h)

    assert c.shape == (T, bs, dim) and alpha.shape == (T, bs, n)
    assert jnp.allclose(alpha, a_ref, atol=1e-6, rtol=1e-5)
    assert jnp.allclose(c, c_ref, atol=1e-5, rtol=1e-5)

    # Single-step module-shaped API still works and agrees.
    c1, a1 = intra_attention(h_t_steps[0], h, W)
    jax.block_until_ready((c1, a1))
    assert c1.shape == (bs, dim) and a1.shape == (bs, n)
    assert jnp.allclose(a1, a_ref[0], atol=1e-6, rtol=1e-5)
    assert jnp.allclose(c1, c_ref[0], atol=1e-5, rtol=1e-5)

    print("KERNEL_OK")
</pallas_src>

<mosaic_0001>
module attributes {stable_mosaic.version = 11 : i64} {
  func.func @_intra_attention_kernel(%arg0: i32, %arg1: i32, %arg2: memref<32x32xf32, #tpu.memory_space<vmem>>, %arg3: memref<1x8x32xf32, #tpu.memory_space<vmem>>, %arg4: memref<1x32x128xf32, #tpu.memory_space<vmem>>, %arg5: memref<1x32x128xf32, #tpu.memory_space<vmem>>, %arg6: memref<1x8x128xf32, #tpu.memory_space<vmem>>) attributes {dimension_semantics = [#tpu.dimension_semantics<parallel>, #tpu.dimension_semantics<parallel>], iteration_bounds = array<i64: 2, 1>, scalar_prefetch = 0 : i64, scratch_operands = 0 : i64, tpu.core_type = #tpu.core_type<tc>, window_params = [{pipeline_mode = #tpu.pipeline_mode<synchronous>, transform_indices = @transform_0, window_bounds = array<i64: 32, 32>}, {transform_indices = @transform_1, window_bounds = array<i64: 1, 8, 32>}, {transform_indices = @transform_2, window_bounds = array<i64: 1, 32, 128>}, {transform_indices = @transform_3, window_bounds = array<i64: 1, 32, 128>}, {transform_indices = @transform_4, window_bounds = array<i64: 1, 8, 128>}]} {
    %c0 = arith.constant 0 : index
    %c0_0 = arith.constant 0 : index
    %0 = vector.load %arg2[%c0, %c0_0] : memref<32x32xf32, #tpu.memory_space<vmem>>, vector<32x32xf32>
    %c0_1 = arith.constant 0 : index
    %c0_2 = arith.constant 0 : index
    %c0_3 = arith.constant 0 : index
    %1 = vector.load %arg3[%c0_1, %c0_2, %c0_3] : memref<1x8x32xf32, #tpu.memory_space<vmem>>, vector<1x8x32xf32>
    %2 = vector.shape_cast %1 : vector<1x8x32xf32> to vector<8x32xf32>
    %c0_4 = arith.constant 0 : index
    %c0_5 = arith.constant 0 : index
    %c0_6 = arith.constant 0 : index
    %3 = vector.load %arg4[%c0_4, %c0_5, %c0_6] : memref<1x32x128xf32, #tpu.memory_space<vmem>>, vector<1x32x128xf32>
    %4 = vector.shape_cast %3 : vector<1x32x128xf32> to vector<32x128xf32>
    %cst = arith.constant dense<0.000000e+00> : vector<32x128xf32>
    %5 = tpu.matmul %0, %4, %cst {dimension_numbers = #tpu.dot_dimension_numbers<[1], [0], [0], [1], [0, 0, 1, 1], [], []>} : vector<32x32xf32>, vector<32x128xf32>, vector<32x128xf32> -> vector<32x128xf32>
    %cst_7 = arith.constant dense<0.000000e+00> : vector<8x128xf32>
    %6 = tpu.matmul %2, %5, %cst_7 {dimension_numbers = #tpu.dot_dimension_numbers<[1], [0], [0], [1], [0, 0, 1, 1], [], []>} : vector<8x32xf32>, vector<32x128xf32>, vector<8x128xf32> -> vector<8x128xf32>
    %cst_8 = arith.constant dense<0xFF800000> : vector<128xf32>
    %7 = vector.multi_reduction <maximumf>, %6, %cst_8 [0] : vector<8x128xf32> to vector<128xf32>
    %8 = vector.shape_cast %7 : vector<128xf32> to vector<1x128xf32>
    %9 = vector.broadcast %8 : vector<1x128xf32> to vector<8x128xf32>
    %10 = arith.subf %6, %9 : vector<8x128xf32>
    %11 = math.exp %10 : vector<8x128xf32>
    %cst_9 = arith.constant dense<0.000000e+00> : vector<128xf32>
    %12 = vector.multi_reduction <add>, %11, %cst_9 [0] : vector<8x128xf32> to vector<128xf32>
    %13 = vector.shape_cast %12 : vector<128xf32> to vector<1x128xf32>
    %14 = tpu.reciprocal %13 : vector<1x128xf32> -> vector<1x128xf32>
    %15 = vector.broadcast %14 : vector<1x128xf32> to vector<8x128xf32>
    %16 = arith.mulf %11, %15 : vector<8x128xf32>
    %cst_10 = arith.constant dense<0.000000e+00> : vector<32x128xf32>
    %17 = tpu.matmul %2, %16, %cst_10 {dimension_numbers = #tpu.dot_dimension_numbers<[0], [0], [1], [1], [0, 1, 1, 1], [], []>} : vector<8x32xf32>, vector<8x128xf32>, vector<32x128xf32> -> vector<32x128xf32>
    %c0_11 = arith.constant 0 : index
    %c0_12 = arith.constant 0 : index
    %c0_13 = arith.constant 0 : index
    %18 = vector.load %arg5[%c0_11, %c0_12, %c0_13] : memref<1x32x128xf32, #tpu.memory_space<vmem>>, vector<1x32x128xf32>
    %19 = vector.shape_cast %18 : vector<1x32x128xf32> to vector<32x128xf32>
    %20 = vector.shape_cast %17 : vector<32x128xf32> to vector<1x32x128xf32>
    tpu.vector_store %arg5[%c0_11, %c0_12, %c0_13], %20 {strides = array<i32>} : memref<1x32x128xf32, #tpu.memory_space<vmem>>, vector<1x32x128xf32>,
    %c0_14 = arith.constant 0 : index
    %c0_15 = arith.constant 0 : index
    %c0_16 = arith.constant 0 : index
    %21 = vector.load %arg6[%c0_14, %c0_15, %c0_16] : memref<1x8x128xf32, #tpu.memory_space<vmem>>, vector<1x8x128xf32>
    %22 = vector.shape_cast %21 : vector<1x8x128xf32> to vector<8x128xf32>
    %23 = vector.shape_cast %16 : vector<8x128xf32> to vector<1x8x128xf32>
    tpu.vector_store %arg6[%c0_14, %c0_15, %c0_16], %23 {strides = array<i32>} : memref<1x8x128xf32, #tpu.memory_space<vmem>>, vector<1x8x128xf32>,
    return
  }
  func.func @transform_0(%arg0: i32, %arg1: i32) -> (i32, i32) {
    %c0_i32 = arith.constant 0 : i32
    %c0_i32_0 = arith.constant 0 : i32
    %c0_i32_1 = arith.constant 0 : i32
    return %c0_i32, %c0_i32_0 : i32, i32
  }
  func.func @transform_1(%arg0: i32, %arg1: i32) -> (i32, i32, i32) {
    %c0_i32 = arith.constant 0 : i32
    %c0_i32_0 = arith.constant 0 : i32
    %c0_i32_1 = arith.constant 0 : i32
    return %arg0, %c0_i32, %c0_i32_0 : i32, i32, i32
  }
  func.func @transform_2(%arg0: i32, %arg1: i32) -> (i32, i32, i32) {
    %c0_i32 = arith.constant 0 : i32
    %c0_i32_0 = arith.constant 0 : i32
    return %arg0, %c0_i32, %arg1 : i32, i32, i32
  }
  func.func @transform_3(%arg0: i32, %arg1: i32) -> (i32, i32, i32) {
    %c0_i32 = arith.constant 0 : i32
    %c0_i32_0 = arith.constant 0 : i32
    return %arg0, %c0_i32, %arg1 : i32, i32, i32
  }
  func.func @transform_4(%arg0: i32, %arg1: i32) -> (i32, i32, i32) {
    %c0_i32 = arith.constant 0 : i32
    %c0_i32_0 = arith.constant 0 : i32
    return %arg0, %c0_i32, %arg1 : i32, i32, i32
  }
}

</mosaic_0001>

<bundles_post_ra>
// kernel: tpu_custom_call.1
= control target key start
LH: loop header
LB: loop body
LE: loop exit
PB: predicated region body
PF: predicated region fallthrough
CT: control target
= control target key end

     0   :  { %s1546_s0 = inlined_call_operand.hbm [shape: f32[32,32], index: 0, kind: input, shape index: {}]   ;;  %s1547_s1 = inlined_call_operand.hbm [shape: f32[2,8,32], index: 1, kind: input, shape index: {}]   ;;  %s1548_s2 = inlined_call_operand.hbm [shape: f32[2,32,128], index: 2, kind: input, shape index: {}]   ;;  %s1549_s3 = inlined_call_operand.hbm [shape: f32[2,32,128], index: 3, kind: output, shape index: {0}]   ;;  %s1550_s4 = inlined_call_operand.hbm [shape: f32[2,8,128], index: 4, kind: output, shape index: {1}]  }
   0x1   :  { %1555 = sst [smem:[#allocation15_spill]] %s1547_s1 }
   0x2   :  { %10 = vsyncpa [#allocation3], 0 }
   0x3   :  { %11 = vsyncpa [#allocation6], 0 }
   0x4   :  { %13 = vsyncpa [#allocation6 + $0x1], 0 }
   0x5   :  { %14 = vsyncpa [#allocation4], 0 }
   0x6   :  { %16 = vsyncpa [#allocation4 + $0x1], 0 }
   0x7   :  { %17 = vsyncpa [#allocation10], 0 }
   0x8   :  { %19 = vsyncpa [#allocation10 + $0x1], 0  ;;  %s1249_s15 = smov 0   ;;  %s1251_s16 = smov 0  }
   0x9   :  { %s1253_s17 = smov 0   ;;  %s1255_s18 = smov 0  }
   0xa   :  { %s1257_s19 = smov 0   ;;  %s1259_s20 = smov 0  }
   0xb LB: > { %s37_s21 = sadd.s32 1, %s1206_s19  ;;  %s65_s22 = sadd.s32 1, %s1198_s17  ;;  %s1210_s20 = sphi %s1259_s20, %s25_s20   ;;  %s1206_s19 = sphi %s1257_s19, %s1576_s19   ;;  %s1202_s18 = sphi %s1255_s18, %s1575_s18   ;;  %s1198_s17 = sphi %s1253_s17, %s1574_s17   ;;  %s1194_s16 = sphi %s1251_s16, %s1573_s16   ;;  %s1190_s15 = sphi %s1249_s15, %s1572_s15  }
   0xc   : > { %p39_p0 = scmp.ge.s32.totalorder %s37_s21, 2  ;;  %p72_p1 = scmp.ne.s32.totalorder %s1198_s17, %s1194_s16 }
   0xd   : > { %p73_p2 = scmp.eq.s32.totalorder %s1210_s20, 0  ;;  %p941_p5 = scmp.lt.s32.totalorder %s1210_s20, 2 }
   0xe   : > { %s1578_s21 = smov (%p39_p0, %s37_s21), 0  ;;  %s199_s24 = sand.u32 1, %s1210_s20  }
   0xf   : > { %p74_p4 = por %p73_p2, %p72_p1  ;;  %s62_s23 = ssub.s32 %s1206_s19, %s1578_s21 }
  0x10   : > { %p63_p6 = scmp.eq.s32.totalorder %s62_s23, 0  ;;  %s201_s25 = sand.u32 1, %s1198_s17  }
  0x11   : > { %s817_s26 = sshll.u32 %s1206_s19, 7  ;;  %s816_s28 = sshll.u32 %s201_s25, 3 }
  0x12   : > { %s1297_s27 = scalar_select %p63_p6, %s1198_s17, %s65_s22  }
  0x13   : > { %s1556_s1 = sld [smem:[#allocation15_spill]]  ;;  %p1304_p7 = pnand %p941_p5, %p74_p4 }
  0x14   : > { %s203_s7 = scalar_lea.vmem [#allocation5], %s816_s28  ;;  %s1308_s9 = sshll.u32 %s201_s25, 5 }
  0x15   : > { %s210_s8 = sshll.u32 %s203_s7, 4  ;;  %s1312_s10 = scalar_lea.sflag [#allocation6], %s199_s24  ;;  %s1310_s8 = int_to_ptr.vmem [resolvable:$true] %s210_s8 }
  0x16   : > { %p1006_p9 = pneg %p1304_p7 }
  0x19   : > { %s1302_s5 = scalar_lea.hbm %s1556_s1, %s817_s26  ;;  %s1009_s14 = scalar_lea.hbm %s1556_s1, 256 }
  0x1a   : > { %s1004_s11 = scalar_lea.hbm %s1302_s5, 128  ;;  %p1010_p12 = scmp.lt.u32.totalorder %s1302_s5, %s1556_s1 }
  0x1b   : > { %p1005_p8 = scmp.ne.s32.totalorder %s1302_s5, %s1004_s11  ;;  %p1011_p13 = scmp.lt.u32.totalorder %s1009_s14, %s1004_s11 }
  0x1c   : > { %p1013_p2 = scmp.lt.u32.totalorder %s1004_s11, %s1302_s5 }
  0x1d   : > { %p1007_p10 = pnand %p1006_p9, %p1005_p8  ;;  %p1012_p0 = por %p1011_p13, %p1010_p12 }
  0x1f   : > { %p1008_p11 = pneg %p1007_p10  ;;  %p1014_p4 = por %p1013_p2, %p1012_p0 }
  0x21   : > { %p1015_p5 = pnand %p1014_p4, %p1008_p11 }
  0x23   : > { %1018 = shalt.err (!%p1015_p5)
}
  0x24   : > { %s1019_s24 = scalar_lea.vmem %s1310_s8, 128  ;;  %s1212_s25 = smov [#allocation5]  }
  0x25   : > { %p1020_p6 = scmp.ne.s32.totalorder %s1310_s8, %s1019_s24  ;;  %s1024_s26 = sshll.u32 %s1212_s25, 4  ;;  %s1025_s26 = int_to_ptr.vmem [resolvable:$false] %s1024_s26 }
  0x26   : > { %s1026_s28 = scalar_lea.vmem %s1025_s26, 256  ;;  %p1027_p3 = scmp.lt.s32.totalorder %s1310_s8, %s1025_s26 }
  0x27   : > { %p1022_p8 = pnand %p1020_p6, %p1006_p9  ;;  %p1028_p12 = scmp.lt.s32.totalorder %s1026_s28, %s1019_s24 }
  0x29   : > { %p1023_p10 = pneg %p1022_p8  ;;  %p1029_p13 = por %p1028_p12, %p1027_p3 }
  0x2b   : > { %p1030_p0 = pnand %p1029_p13, %p1023_p10 }
  0x2d   : > { %1033 = shalt.err (!%p1030_p0)
}
  0x2e   : > { %929 = dma.hbm_to_vmem [thread:$0]  (!%p1304_p7), %s1302_s5, 128, %s1310_s8, %s1312_s10  }
  0x2f   : > { %s843_s29 = sshll.u32 %s1206_s19, 9  ;;  %s221_s30 = scalar_lea.vmem [#allocation7], %s1308_s9 }
  0x30   : > { %s229_s7 = sshll.u32 %s221_s30, 4  ;;  %s1343_s11 = sadd.s32 4294967295, %s1210_s20   ;;  %s1369_s7 = int_to_ptr.vmem [resolvable:$true] %s229_s7 }
  0x31   : > { %s812_s12 = sadd.s32 4294967294, %s1210_s20   ;;  %p78_p3 = scmp.ne.s32.totalorder %s1194_s16, %s1190_s15 }
  0x32   : > { %p1551_p11 = scmp.eq.s32.totalorder %s1343_s11, 0  ;;  %p132_p2 = scmp.eq.s32.totalorder %s1343_s11, 1 }
  0x33   : > { %p138_p4 = scmp.eq.s32.totalorder %s812_s12, 1  ;;  %p813_p6 = scmp.ge.s32.totalorder %s1210_s20, 1 }
  0x34   : > { %p1352_p5 = por %p1551_p11, %p78_p3  ;;  %p1360_p8 = por %p132_p2, %p72_p1 }
  0x35   : > { %p1364_p10 = por %p138_p4, %p78_p3  ;;  %p173_p12 = scmp.lt.s32.totalorder %s1210_s20, 3 }
  0x36   : > { %s1558_s13 = scalar_select %p1352_p5, 1, 0 }
  0x37   : > { %s1559_s5 = scalar_select %p1360_p8, 1, 0 }
  0x38   : > { %s1560_s8 = scalar_select %p1364_p10, 1, 0 }
  0x39   : > { %p1371_p13 = pnand %p813_p6, %p173_p12  ;;  %s1213_s14 = smov [#allocation2]  }
  0x3a   : > { %s1375_s22 = sshll.u32 %s1213_s14, 4  ;;  %s1382_s25 = scalar_lea.hbm %s1548_s2, %s843_s29  ;;  %s186_s22 = int_to_ptr.vmem [resolvable:$true] %s1375_s22 }
  0x3b   : > { %s1561_s9 = scalar_select %p1371_p13, 1, 0 }
  0x3c   : > { %s1034_s26 = scalar_lea.hbm %s1382_s25, 512  ;;  %s1039_s12 = scalar_lea.hbm %s1548_s2, 1024 }
  0x3d   : > { %p1035_p0 = scmp.ne.s32.totalorder %s1382_s25, %s1034_s26  ;;  %p1040_p4 = scmp.lt.u32.totalorder %s1382_s25, %s1548_s2 }
  0x3e   : > { %p1041_p6 = scmp.lt.u32.totalorder %s1039_s12, %s1034_s26  ;;  %p1043_p1 = scmp.lt.u32.totalorder %s1034_s26, %s1382_s25 }
  0x3f   : > { %p1037_p3 = pnand %p1035_p0, %p1006_p9 }
  0x40   : > { %p1042_p12 = por %p1041_p6, %p1040_p4 }
  0x41   : > { %p1038_p2 = pneg %p1037_p3 }
  0x42   : > { %p1044_p11 = por %p1043_p1, %p1042_p12 }
  0x44   : > { %p1045_p10 = pnand %p1044_p11, %p1038_p2 }
  0x46   : > { %1048 = shalt.err (!%p1045_p10)
}
  0x47   : > { %s1049_s29 = scalar_lea.vmem %s1369_s7, 512  ;;  %s1214_s23 = smov [#allocation7]  }
  0x48   : > { %p1050_p0 = scmp.ne.s32.totalorder %s1369_s7, %s1049_s29  ;;  %s1054_s24 = sshll.u32 %s1214_s23, 4  ;;  %s1055_s24 = int_to_ptr.vmem [resolvable:$false] %s1054_s24 }
  0x49   : > { %s1056_s1 = scalar_lea.vmem %s1055_s24, 1024  ;;  %p1057_p5 = scmp.lt.s32.totalorder %s1369_s7, %s1055_s24 }
  0x4a   : > { %p1052_p3 = pnand %p1050_p0, %p1006_p9  ;;  %p1058_p4 = scmp.lt.s32.totalorder %s1056_s1, %s1049_s29 }
  0x4c   : > { %p1053_p8 = pneg %p1052_p3  ;;  %p1059_p6 = por %p1058_p4, %p1057_p5 }
  0x4e   : > { %p1060_p1 = pnand %p1059_p6, %p1053_p8 }
  0x50   : > { %1063 = shalt.err (!%p1060_p1)
}
  0x51   : > { %s1215_s26 = smov 128   ;;  %s1216_s28 = smov 8  }
  0x52   : > { %932 = dma.hbm_to_vmem [thread:$0]  (!%p1304_p7), %s1382_s25, 512, %s1369_s7, %s1312_s10, %s1215_s26, %s1215_s26, %s1216_s28  }
  0x53   : > { %p1562_p9 = scmp.eq.s32.totalorder %s1343_s11, 0  ;;  %p1563_p11 = pneg %p1371_p13 }
  0x54   : > { %s1064_s29 = scalar_lea.hbm %s1546_s0, 512 }
  0x55   : > { %p1414_p10 = pnand %p1563_p11, %p1562_p9  ;;  %p1065_p5 = scmp.ne.s32.totalorder %s1546_s0, %s1064_s29 }
  0x56   : > { %p1071_p12 = scmp.lt.u32.totalorder %s1064_s29, %s1546_s0 }
  0x57   : > { %p1066_p8 = pneg %p1414_p10 }
  0x59   : > { %p1067_p7 = pnand %p1066_p8, %p1065_p5 }
  0x5b   : > { %p1068_p2 = pneg %p1067_p7 }
  0x5d   : > { %p1073_p0 = pnand %p1071_p12, %p1068_p2 }
  0x5f   : > { %1076 = shalt.err (!%p1073_p0)
}
  0x60   : > { %s1077_s7 = scalar_lea.vmem %s186_s22, 512  ;;  %p1085_p1 = scmp.lt.s32.totalorder %s186_s22, %s186_s22 }
  0x61   : > { %p1078_p3 = scmp.ne.s32.totalorder %s186_s22, %s1077_s7  ;;  %p1086_p9 = scmp.lt.s32.totalorder %s1077_s7, %s1077_s7 }
  0x63   : > { %p1080_p4 = pnand %p1078_p3, %p1066_p8  ;;  %p1087_p11 = por %p1086_p9, %p1085_p1 }
  0x65   : > { %p1081_p6 = pneg %p1080_p4 }
  0x67   : > { %p1088_p13 = pnand %p1087_p11, %p1081_p6 }
  0x69   : > { %1091 = shalt.err (!%p1088_p13)
}
  0x6a   : > { %925 = dma.hbm_to_vmem [thread:$0]  (!%p1414_p10), %s1546_s0, 512, %s186_s22, [#allocation3], %s1215_s26, %s1215_s26, %s1216_s28  }
  0x6b   : > { %p1565_p5 = scmp.ne.s32.totalorder %s1561_s9, 0 }
  0x6c   : > { %p1566_p7 = scmp.eq.s32.totalorder (!%p1565_p5), %s1343_s11, 0 }
  0x6d   : > { %241 = sbr.rel (%p1565_p5) target bundleno = 855 (0x357), region = 32 }
  0x74   : > { %1173 = dma.done.wait (%p1566_p7), [#allocation3], 512   ;;  %p1567_p8 = pmov %p1566_p7 }
  0x75   : > { %s247_s12 = sand.u32 1, %s1343_s11   ;;  %s1442_s14 = sand.u32 1, %s1194_s16  }
  0x76   : > { %1175 = vsyncadd (%p1567_p8), [#allocation3], 4294966784  ;;  %s823_s30 = sshll.u32 %s1442_s14, 3  ;;  %s248_s29 = scalar_lea.sflag [#allocation6], %s247_s12 }
  0x77   : > { %s251_s22 = scalar_lea.vmem [#allocation5], %s823_s30  ;;  %p1568_p13 = scmp.ne.s32.totalorder %s1558_s13, 0 }
  0x79   : > { %1177 = dma.done.wait (%p1568_p13), %s248_s29, 640  }
  0x7a   : > { %1179 = vsyncadd (%p1568_p13), %s248_s29, 4294966656  ;;  %s824_s9 = sshll.u32 %s1442_s14, 5  ;;  %vm304_vm0 = vcmask 261120   ;;  %v295_v5 = vld [vmem:[#allocation2] sm:$0xff]  ;;  %v296_v7 = vld [vmem:[#allocation2 + $0x8] sm:$0xff]  ;;  %v1217_v10 = vmov 0.0|0.0  }
  0x7b   : > { %s260_s26 = scalar_lea.vmem [#allocation7], %s824_s9  ;;  %871 = vmatprep.mubr.msk.f32.mxu0 %vm304_vm0, %v295_v5  ;;  %v297_v8 = vld [vmem:[#allocation2 + $0x10] sm:$0xff]  ;;  %v298_v9 = vld [vmem:[#allocation2 + $0x18] sm:$0xff]  ;;  %904 = vmatprep.subr.bf16.mxu1 %v1217_v10  ;;  %v299_v11 = vld [vmem:[%s251_s22] sm:$0xff]  ;;  %vm1218_vm1 = vmmov 0   ;;  %v1219_v12 = vmov 0.0  }
  0x7c   : > { %v300_v0 = vld [vmem:[%s260_s26] sm:$0xff]  ;;  %v301_v1 = vld [vmem:[%s260_s26 + $0x8] sm:$0xff]  ;;  %v302_v2 = vld [vmem:[%s260_s26 + $0x10] sm:$0xff]  ;;  %885 = vmatprep.mubr.msk.f32.mxu1 %vm1218_vm1, %v1219_v12  ;;  %492 = vxpose.xlu0.b32.start.end [1/1] (short) (narrow) %v299_v11, 32  ;;  %vm524_vm2 = vcmask 64512   ;;  %s294_s11 = scalar_lea.vmem [#allocation9], %s823_s30 }
  0x7d   : > { %v896_v3 = vpack.c.bf16 %v301_v1, %v300_v0  ;;  %v303_v4 = vld [vmem:[%s260_s26 + $0x18] sm:$0xff]  ;;  %s840_s13 = sshll.u32 %s1202_s18, 7  ;;  %s664_s6 = sshll.u32 %s294_s11, 4  ;;  %s665_s6 = int_to_ptr.vmem [resolvable:$true] %s664_s6 }
  0x7e   : > { %v900_v6 = vpack.c.bf16 %v303_v4, %v302_v2  ;;  %s1469_s24 = scalar_lea.hbm %s1550_s4, %s840_s13  ;;  %s633_s10 = scalar_lea.sflag [#allocation10], %s1442_s14 }
  0x7f   : > { %897 = vmatprep.subr.bf16.mxu0 %v896_v3  ;;  %s1092_s7 = scalar_lea.vmem %s665_s6, 128  ;;  %p1569_p2 = scmp.ne.s32.totalorder %s1559_s5, 0 }
  0x80   : > { %899 = vmatpush3.bf16.msra.mxu0 %v896_v3  ;;  %p1093_p10 = scmp.ne.s32.totalorder %s665_s6, %s1092_s7  ;;  %s1220_s25 = smov [#allocation9]  }
  0x81   : > { %901 = vmatprep.subr.bf16.mxu0 %v900_v6  ;;  %s1096_s1 = sshll.u32 %s1220_s25, 4  ;;  %s1097_s1 = int_to_ptr.vmem [resolvable:$false] %s1096_s1 }
  0x82   : > { %p1094_p12 = pnand %p1093_p10, %p1569_p2  ;;  %s1098_s12 = scalar_lea.vmem %s1097_s1, 256 }
  0x83   : > { %p1099_p3 = scmp.lt.s32.totalorder %s665_s6, %s1097_s1  ;;  %p1100_p4 = scmp.lt.s32.totalorder %s1098_s12, %s1092_s7 }
  0x84   : > { %903 = vmatpush3.bf16.msra.mxu0 %v900_v6  ;;  %p1095_p0 = pneg %p1094_p12 }
  0x85   : > { %p1101_p6 = por %p1100_p4, %p1099_p3 }
  0x87   : > { %872 = vmatmul.mubr.msk.f32.vlgmr.msra.gmra.mrb[0].mxu0 %vm304_vm0, %v296_v7  ;;  %p1102_p1 = pnand %p1101_p6, %p1095_p0 }
  0x88   : > { %874 = vmatprep.mubr.msk.f32.mxu0 %vm304_vm0, %v297_v8 }
  0x8b   : > { %875 = vmatmul.mubr.msk.f32.gmra.mrb[2].mxu0 %vm304_vm0, %v298_v9 }
  0xfc   : > { %v508_v19 = vpop.trf.xlu0 }
 0x100   : > { %v509_v37 = vpop.trf.xlu0 }
 0x104   : > { %v510_v39 = vpop.trf.xlu0 }
 0x108   : > { %v511_v41 = vpop.trf.xlu0 }
 0x15a   : > { %v873_v13 = vpop.f32.mrb[0].mxu0 }
 0x15b   : > { %v383_v14 = vpop.f32.mrb[1].mxu0 }
 0x15c   : > { %v905_v15 = vpack.c.bf16 %v873_v13, %v383_v14 }
 0x15e   : > { %v876_v16 = vpop.f32.mrb[2].mxu0  ;;  %906 = vmatpush3.bf16.msra.mxu1 %v905_v15 }
 0x15f   : > { %v393_v17 = vpop.f32.mrb[3].mxu0  ;;  %907 = vmatprep.subr.bf16.mxu1 %v1217_v10 }
 0x160   : > { %v908_v18 = vpack.c.bf16 %v876_v16, %v393_v17 }
 0x162   : > { %909 = vmatpush3.bf16.msra.mxu1 %v908_v18 }
 0x165   : > { %886 = vmatmul.mubr.msk.f32.vlgmr.msra.gmra.mrb[0].mxu1 %vm304_vm0, %v299_v11 }
 0x166   : > { %890 = vmatprep.mubr.msk.f32.mxu1 %vm524_vm2, %v508_v19 }
 0x238   : > { %v471_v20 = vpop.f32.mrb[0].mxu1 }
 0x239   : > { %v475_v21 = vrot.slane %v471_v20, 4  ;;  %v887_v22 = vpop.f32.mrb[1].mxu1 }
 0x23b   : > { %v476_v23 = vmax.f32 %v471_v20, %v475_v21 }
 0x23d   : > { %v477_v24 = vrot.slane %v476_v23, 2 }
 0x23f   : > { %v478_v25 = vmax.f32 %v476_v23, %v477_v24 }
 0x241   : > { %v479_v26 = vrot.slane %v478_v25, 1 }
 0x243   : > { %v480_v27 = vmax.f32 %v478_v25, %v479_v26 }
 0x245   : > { %v481_v28 = vsub.f32 %v471_v20, %v480_v27 }
 0x247   : > { %v482_v29 = vmul.f32 1.442695, %v481_v28 }
 0x249   : > { %1000 = vpow2.f32 %v482_v29 }
 0x253   : > { %v1001_v30 = vpop.eup %1000 }
 0x254   : > { %v484_v31 = vrot.slane %v1001_v30, 4 }
 0x256   : > { %v485_v32 = vadd.f32 %v1001_v30, %v484_v31 }
 0x258   : > { %v486_v33 = vrot.slane %v485_v32, 2 }
 0x25a   : > { %v487_v34 = vadd.f32 %v486_v33, %v485_v32 }
 0x25c   : > { %v488_v35 = vrot.slane %v487_v34, 1 }
 0x25e   : > { %v489_v36 = vadd.f32 %v488_v35, %v487_v34 }
 0x260   : > { %1002 = vrcp.f32 %v489_v36 }
 0x26a   : > { %v1003_v38 = vpop.eup %1002 }
 0x26b   : > { %v491_v40 = vmul.f32 %v1003_v38, %v1001_v30 }
 0x26d   : > { %888 = vmatprep.subr.mxu1 %v491_v40  ;;  %626 = vst [vmem:[%s294_s11] sm:$0xff] %v491_v40 }
 0x26e   : > { %889 = vmatpush3.msra.mxu1 %v491_v40 }
 0x26f   : > { %891 = vmatmul.mubr.msk.f32.vlgmr.msra.gmra.mrb[2].mxu1 %vm524_vm2, %v509_v37 }
 0x270   : > { %893 = vmatprep.mubr.msk.f32.mxu1 %vm524_vm2, %v510_v39 }
 0x273   : > { %894 = vmatmul.mubr.msk.f32.gmra.mrb[4].mxu1 %vm524_vm2, %v511_v41 }
 0x274   : > { %1105 = shalt.err (!%p1102_p1)
}
 0x275   : > { %s1106_s30 = scalar_lea.hbm %s1469_s24, 128  ;;  %s1110_s26 = scalar_lea.hbm %s1550_s4, 256 }
 0x276   : > { %p1107_p9 = scmp.ne.s32.totalorder %s1469_s24, %s1106_s30  ;;  %p1111_p7 = scmp.lt.u32.totalorder %s1469_s24, %s1550_s4 }
 0x277   : > { %p1112_p8 = scmp.lt.u32.totalorder %s1110_s26, %s1106_s30  ;;  %p1114_p10 = scmp.lt.u32.totalorder %s1106_s30, %s1469_s24 }
 0x278   : > { %p1108_p11 = pnand %p1107_p9, %p1569_p2 }
 0x279   : > { %p1113_p13 = por %p1112_p8, %p1111_p7 }
 0x27a   : > { %p1109_p5 = pneg %p1108_p11 }
 0x27b   : > { %p1115_p12 = por %p1114_p10, %p1113_p13 }
 0x27d   : > { %p1116_p0 = pnand %p1115_p12, %p1109_p5 }
 0x27f   : > { %1119 = shalt.err (!%p1116_p0)
}
 0x280   : > { %919 = dma.vmem_to_hbm [thread:$0]  (%p1569_p2), %s665_s6, 128, %s1469_s24, %s633_s10  }
 0x281   : > { %s287_s28 = scalar_lea.vmem [#allocation8], %s824_s9  ;;  %s844_s7 = sshll.u32 %s1202_s18, 9 }
 0x282   : > { %s647_s23 = sshll.u32 %s287_s28, 4  ;;  %s1497_s12 = scalar_lea.hbm %s1549_s3, %s844_s7  ;;  %s1492_s23 = int_to_ptr.vmem [resolvable:$true] %s647_s23 }
 0x283   : > { %s628_s9 = scalar_lea.sflag [#allocation4], %s1442_s14  ;;  %s1120_s24 = scalar_lea.vmem %s1492_s23, 512 }
 0x284   : > { %p1121_p3 = scmp.ne.s32.totalorder %s1492_s23, %s1120_s24  ;;  %s1221_s18 = smov [#allocation8]  }
 0x285   : > { %s1124_s6 = sshll.u32 %s1221_s18, 4  ;;  %s1125_s6 = int_to_ptr.vmem [resolvable:$false] %s1124_s6 }
 0x286   : > { %p1122_p4 = pnand %p1121_p3, %p1569_p2  ;;  %s1126_s10 = scalar_lea.vmem %s1125_s6, 1024 }
 0x287   : > { %p1127_p1 = scmp.lt.s32.totalorder %s1492_s23, %s1125_s6  ;;  %p1128_p9 = scmp.lt.s32.totalorder %s1126_s10, %s1120_s24 }
 0x288   : > { %p1123_p6 = pneg %p1122_p4 }
 0x289   : > { %p1129_p11 = por %p1128_p9, %p1127_p1 }
 0x28b   : > { %p1130_p5 = pnand %p1129_p11, %p1123_p6 }
 0x342   : > { %v892_v42 = vpop.f32.mrb[2].mxu1 }
 0x343   : > { %623 = vst [vmem:[%s287_s28 + $0x8] sm:$0xff] %v892_v42  ;;  %v603_v43 = vpop.f32.mrb[3].mxu1 }
 0x344   : > { %622 = vst [vmem:[%s287_s28] sm:$0xff] %v603_v43 }
 0x346   : > { %v895_v44 = vpop.f32.mrb[4].mxu1 }
 0x347   : > { %625 = vst [vmem:[%s287_s28 + $0x18] sm:$0xff] %v895_v44  ;;  %v613_v45 = vpop.f32.mrb[5].mxu1 }
 0x348   : > { %624 = vst [vmem:[%s287_s28 + $0x10] sm:$0xff] %v613_v45 }
 0x349   : > { %1133 = shalt.err (!%p1130_p5)
}
 0x34a   : > { %s1134_s30 = scalar_lea.hbm %s1497_s12, 512  ;;  %s1138_s26 = scalar_lea.hbm %s1549_s3, 1024 }
 0x34b   : > { %p1135_p7 = scmp.ne.s32.totalorder %s1497_s12, %s1134_s30  ;;  %p1139_p10 = scmp.lt.u32.totalorder %s1497_s12, %s1549_s3 }
 0x34c   : > { %p1140_p12 = scmp.lt.u32.totalorder %s1138_s26, %s1134_s30  ;;  %p1142_p3 = scmp.lt.u32.totalorder %s1134_s30, %s1497_s12 }
 0x34d   : > { %p1136_p8 = pnand %p1135_p7, %p1569_p2 }
 0x34e   : > { %p1141_p0 = por %p1140_p12, %p1139_p10 }
 0x34f   : > { %p1137_p13 = pneg %p1136_p8 }
 0x350   : > { %p1143_p4 = por %p1142_p3, %p1141_p0 }
 0x352   : > { %p1144_p6 = pnand %p1143_p4, %p1137_p13 }
 0x354   : > { %1147 = shalt.err (!%p1144_p6)
}
 0x355   : > { %s1222_s28 = smov 128   ;;  %s1223_s7 = smov 8  }
 0x356   : > { %918 = dma.vmem_to_hbm [thread:$0]  (%p1569_p2), %s1492_s23, 512, %s1497_s12, %s628_s9, %s1222_s28, %s1222_s28, %s1223_s7  }
 0x357 PF: > { %s676_s25 = sand.u32 1, %s1190_s15   ;;  %p1570_p1 = scmp.ne.s32.totalorder %s1560_s8, 0 }
 0x358   : > { %p1571_p9 = scmp.ge.s32.totalorder %s1210_s20, 2  ;;  %s677_s1 = scalar_lea.sflag [#allocation4], %s676_s25 }
 0x35a   : > { %p934_p11 = pnand %p1571_p9, %p1570_p1 }
 0x35c   : > { %1181 = dma.done.wait (!%p934_p11), %s677_s1, 512  }
 0x35d   : > { %1183 = vsyncadd (!%p934_p11), %s677_s1, 4294966784  ;;  %s686_s24 = scalar_lea.sflag [#allocation10], %s676_s25 }
 0x35e   : > { %1185 = dma.done.wait (!%p934_p11), %s686_s24, 128  }
 0x35f   : > { %1187 = vsyncadd (!%p934_p11), %s686_s24, 4294967168  ;;  %s25_s20 = sadd.s32 1, %s1210_s20   ;;  %s1572_s15 = smov %s1194_s16 }
 0x360   : > { %p22_p5 = scmp.ge.s32.totalorder %s25_s20, 4   ;;  %s1573_s16 = smov %s1198_s17 }
 0x361   : > { %s1574_s17 = smov %s1297_s27  ;;  %s1575_s18 = smov %s1206_s19 }
 0x362   : > { %s1576_s19 = smov %s1578_s21  ;;  %24 = sbr.rel (!%p22_p5) target bundleno = 11 (0xb), region = 110 }
 0x369   :  { %691 = vsyncpa [#allocation3], 1 }
 0x36a   :  { %693 = vsyncpa [#allocation3 + $0x1], 1 }
 0x36b   :  { %694 = vsyncpa [#allocation6], 1 }
 0x36c   :  { %696 = vsyncpa [#allocation6 + $0x1], 1 }
 0x36d   :  { %697 = vsyncpa [#allocation4], 1 }
 0x36e   :  { %699 = vsyncpa [#allocation4 + $0x1], 1 }
 0x36f   :  { %700 = vsyncpa [#allocation10], 1 }
 0x370   :  { %702 = vsyncpa [#allocation10 + $0x1], 1 }

</bundles_post_ra>
